<compile_context>
chip_gen: v6e
topology: v6e:2x2x1
jax: 0.10.0
libtpu: 0.0.40
codegen_flags: <defaults>
</compile_context>

<pallas_src>
import jax
import jax.numpy as jnp
from jax.experimental import pallas as pl
from jax.experimental.pallas import tpu as pltpu

_VMEM_LIMIT_BYTES = 32 * 1024 * 1024
_MIN_PALLAS_BYTES_DEFAULT = 1 << 20  # below this, a plain XLA cast wins


def _to_copy_kernel(x_ref, o_ref):
    # Pure elementwise copy with dtype cast (VPU); memory-bandwidth bound.
    o_ref[...] = x_ref[...].astype(o_ref.dtype)


def _block_target_bytes_and_buffers():
    """Generation-aware (per-block byte target of the wider dtype, buffer depth)."""
    try:
        vmem_bytes = int(pltpu.get_tpu_info().vmem_capacity_bytes)
    except Exception:  # info unavailable -> conservative v5e/v6e-style default
        vmem_bytes = 128 * 1024 * 1024
    if vmem_bytes <= 64 * 1024 * 1024:
        # v7x-class: per-step overhead dominates at 3.2 TB/s; 4 MiB blocks with
        # a 3-deep pipeline (3 * (4 + 4) MiB = 24 MiB <= 32 MiB scoped limit).
        return 4 * 1024 * 1024, 3
    # v5e / v6e: ~4 MiB blocks sit on the measured ~86%+ HBM-roofline plateau;
    # double-buffered footprint 2 * (4 + 4) MiB = 16 MiB <= 32 MiB limit.
    return 4 * 1024 * 1024, 2


def _copy_cast_2d(x2d, out_dtype, block_rows, buffer_count):
    """Streamed copy/cast of a (rows, lanes) slab with (block_rows, lanes) tiles."""
    rows, lanes = x2d.shape
    grid = (pl.cdiv(rows, block_rows),)

    if buffer_count is None or buffer_count == 2:
        in_spec = pl.BlockSpec((block_rows, lanes), lambda i: (i, 0))
        out_spec = pl.BlockSpec((block_rows, lanes), lambda i: (i, 0))
    else:
        in_spec = pl.BlockSpec((block_rows, lanes), lambda i: (i, 0),
                               pipeline_mode=pl.Buffered(buffer_count))
        out_spec = pl.BlockSpec((block_rows, lanes), lambda i: (i, 0),
                                pipeline_mode=pl.Buffered(buffer_count))

    return pl.pallas_call(
        _to_copy_kernel,
        out_shape=jax.ShapeDtypeStruct((rows, lanes), out_dtype),
        grid_spec=pltpu.PrefetchScalarGridSpec(
            num_scalar_prefetch=0,
            grid=grid,
            in_specs=[in_spec],
            out_specs=out_spec,
        ),
        compiler_params=pltpu.CompilerParams(
            # "parallel" lets v7x shard the grid across both TensorCores.
            dimension_semantics=("parallel",),
            # Explicit headroom above the v5e 16 MiB scoped default; block
            # sizing keeps the pipelined footprint <= 24 MiB.
            vmem_limit_bytes=_VMEM_LIMIT_BYTES,
        ),
    )(x2d)


def to_copy(x, dtype=None, *, block_rows=None,
            min_pallas_bytes=_MIN_PALLAS_BYTES_DEFAULT, **unused_kwargs):
    """Pallas equivalent of torch.ops.aten._to_copy.default(x, dtype=dtype).

    `block_rows` / `min_pallas_bytes` are exposed only for testing.
    layout/device/pin_memory/non_blocking/memory_format kwargs are ignored.
    """
    out_dtype = jnp.dtype(x.dtype if dtype is None else dtype)
    orig_shape = x.shape
    total = int(x.size)

    if total == 0:
        return jnp.zeros(orig_shape, out_dtype)

    in_itemsize = jnp.dtype(x.dtype).itemsize
    in_bytes = total * in_itemsize
    out_bytes = total * out_dtype.itemsize

    # Tiny tensors and ragged element counts: a plain XLA convert is already
    # at the HBM roofline (and can fuse with neighbouring elementwise ops); a
    # pallas_call only adds launch overhead, and a ragged pad+slice path would
    # triple HBM traffic.
    if total % 128 != 0 or max(in_bytes, out_bytes) < min_pallas_bytes:
        return x.astype(out_dtype)

    bytes_per_elem = max(in_itemsize, out_dtype.itemsize)

    # Lane-dense slab with NO pad and NO tail slice.
    lanes = 128
    for cand in (2048, 1024, 512, 256):
        if total % cand == 0:
            lanes = cand
            break
    rows = total // lanes
    x2d = jnp.reshape(x, (rows, lanes))

    target_bytes, buffer_count = _block_target_bytes_and_buffers()

    if block_rows is None:
        # ~target_bytes of the wider dtype per block; multiple of 32 sublanes
        # so sub-32-bit outputs store full packed tiles (unmasked vst).
        block_rows = target_bytes // (lanes * bytes_per_elem)
        block_rows = max(32, (block_rows // 32) * 32)
        # Keep >= ~4 grid steps on medium/large tensors so the read of block
        # i+1 overlaps the write of block i and v7x megacore sharding survives.
        if max(in_bytes, out_bytes) >= (1 << 20):
            quarter_rows = max(32, ((rows // 4) // 32) * 32)
            block_rows = min(block_rows, quarter_rows)
    block_rows = max(1, min(block_rows, rows))

    out2d = _copy_cast_2d(x2d, out_dtype, block_rows, buffer_count)
    return out2d.reshape(orig_shape)


if __name__ == "__main__":
    key = jax.random.PRNGKey(0)

    # Small NCHW input consistent with HardNet-train activations; force the
    # Pallas path so the kernel itself is exercised even at this tiny size.
    x = jax.random.normal(key, (2, 4, 16, 16), dtype=jnp.float32)
    y = jax.block_until_ready(to_copy(x, dtype=jnp.bfloat16, min_pallas_bytes=0))
    assert y.shape == x.shape and y.dtype == jnp.bfloat16
    assert bool(jnp.all(y == x.astype(jnp.bfloat16)))

    # Pure copy (no dtype change), Pallas path.
    z = jax.block_until_ready(to_copy(x, min_pallas_bytes=0))
    assert z.dtype == x.dtype and bool(jnp.all(z == x))

    # Multi-step grid with a partial last block (block_rows forced small).
    x2 = jax.random.normal(jax.random.PRNGKey(1), (2, 5, 64, 128), jnp.float32)
    y2 = jax.block_until_ready(
        to_copy(x2, dtype=jnp.float16, block_rows=16, min_pallas_bytes=0))
    assert y2.dtype == jnp.float16
    assert bool(jnp.all(y2 == x2.astype(jnp.float16)))

    # Default dispatch policy on a >=1 MiB tensor: auto block sizing, >=4 steps.
    x3 = jax.random.normal(jax.random.PRNGKey(2), (2, 32, 64, 128), jnp.float32)
    y3 = jax.block_until_ready(to_copy(x3, dtype=jnp.bfloat16))
    assert y3.shape == x3.shape and y3.dtype == jnp.bfloat16
    assert bool(jnp.all(y3 == x3.astype(jnp.bfloat16)))

    # Ragged element count (not a multiple of 128) uses the XLA-cast bypass.
    x4 = jax.random.normal(jax.random.PRNGKey(3), (2, 3, 15, 15), jnp.float32)
    y4 = jax.block_until_ready(to_copy(x4, dtype=jnp.bfloat16))
    assert y4.shape == x4.shape and y4.dtype == jnp.bfloat16
    assert bool(jnp.all(y4 == x4.astype(jnp.bfloat16)))

    # Tiny tensor with default policy also uses the XLA-cast bypass.
    y5 = jax.block_until_ready(to_copy(x, dtype=jnp.float16))
    assert y5.dtype == jnp.float16 and bool(jnp.all(y5 == x.astype(jnp.float16)))

    print("KERNEL_OK")
</pallas_src>

<mosaic_0001>
module attributes {stable_mosaic.version = 11 : i64} {
  func.func @_to_copy_kernel(%arg0: i32, %arg1: memref<1x2048xf32, #tpu.memory_space<vmem>>, %arg2: memref<1x2048xbf16, #tpu.memory_space<vmem>>) attributes {dimension_semantics = [#tpu.dimension_semantics<parallel>], iteration_bounds = array<i64: 1>, scalar_prefetch = 0 : i64, scratch_operands = 0 : i64, tpu.core_type = #tpu.core_type<tc>, window_params = [{transform_indices = @transform_0, window_bounds = array<i64: 1, 2048>}, {transform_indices = @transform_1, window_bounds = array<i64: 1, 2048>}]} {
    %c0 = arith.constant 0 : index
    %c0_0 = arith.constant 0 : index
    %0 = vector.load %arg1[%c0, %c0_0] : memref<1x2048xf32, #tpu.memory_space<vmem>>, vector<1x2048xf32>
    %1 = arith.truncf %0 : vector<1x2048xf32> to vector<1x2048xbf16>
    %c0_1 = arith.constant 0 : index
    %c0_2 = arith.constant 0 : index
    %2 = vector.load %arg2[%c0_1, %c0_2] : memref<1x2048xbf16, #tpu.memory_space<vmem>>, vector<1x2048xbf16>
    tpu.vector_store %arg2[%c0_1, %c0_2], %1 {strides = array<i32>} : memref<1x2048xbf16, #tpu.memory_space<vmem>>, vector<1x2048xbf16>,
    return
  }
  func.func @transform_0(%arg0: i32) -> (i32, i32) {
    %c0_i32 = arith.constant 0 : i32
    %c0_i32_0 = arith.constant 0 : i32
    return %arg0, %c0_i32 : i32, i32
  }
  func.func @transform_1(%arg0: i32) -> (i32, i32) {
    %c0_i32 = arith.constant 0 : i32
    %c0_i32_0 = arith.constant 0 : i32
    return %arg0, %c0_i32 : i32, i32
  }
}

</mosaic_0001>

<bundles_post_ra>
// kernel: tpu_custom_call.1
= control target key start
LH: loop header
LB: loop body
LE: loop exit
PB: predicated region body
PF: predicated region fallthrough
CT: control target
= control target key end

     0   :  { %6 = vsyncpa [#allocation3], 0  ;;  %s423_s0 = inlined_call_operand.hbm [shape: f32[1,2048], index: 0, kind: input, shape index: {}]   ;;  %s424_s1 = inlined_call_operand.hbm [shape: bf16[1,2048], index: 1, kind: output, shape index: {}]  }
   0x1   :  { %7 = vsyncpa [#allocation4], 0  ;;  %s344_s6 = smov [#allocation2]  }
   0x2   :  { %s14_s7 = sshll.u32 %s344_s6, 4  ;;  %s15_s7 = int_to_ptr.vmem [resolvable:$true] %s14_s7 }
   0x3   :  { %s308_s8 = scalar_lea.vmem %s15_s7, 256  ;;  %p313_p1 = scmp.lt.s32.totalorder %s15_s7, %s15_s7 }
   0x4   :  { %p309_p0 = scmp.ne.s32.totalorder %s15_s7, %s308_s8  ;;  %p314_p2 = scmp.lt.s32.totalorder %s308_s8, %s308_s8 }
   0x6   :  { %p315_p3 = por %p314_p2, %p313_p1 }
   0x8   :  { %p316_p4 = pnand %p315_p3, %p309_p0 }
   0xa   :  { %319 = shalt.err (!%p316_p4)
}
   0xb   :  { %17 = dma.hbm_to_vmem [thread:$0]  %s423_s0, 256, %s15_s7, [#allocation3]  }
   0xc   :  { %340 = dma.done.wait [#allocation3], 256  }
   0xd   :  { %341 = vsyncadd [#allocation3], 4294967040  ;;  %v25_v0 = vlaneseq  ;;  %vm237_vm0 = vcmask 1040384   ;;  %vm240_vm1 = vcmask 1041409   ;;  %v345_v1 = vmov 1966171168  }
   0xe   :  { %v142_v2 = vunpack.c.l.s4 %v345_v1  ;;  %vm238_vm2 = vsmask.f32 256  ;;  %vm241_vm3 = vsmask.f32 1280  ;;  %vm244_vm5 = vcmask 1042434   ;;  %v21_v16 = vld [vmem:[#allocation2] sm:$0xff] }
   0xf   :  { %v26_v3 = vshrl.u32 %v25_v0, 7  ;;  %vm360_vm4 = vmand %vm237_vm0, %vm238_vm2  ;;  %vm245_vm6 = vsmask.f32 2304  ;;  %vm248_vm8 = vcmask 1043459   ;;  %vm249_vm9 = vsmask.f32 3328 }
  0x10   :  { %v143_v5 = vunpack.c.0.s8 %v142_v2  ;;  %vm364_vm7 = vmand %vm240_vm1, %vm241_vm3  ;;  %vm252_vm10 = vcmask 1044484   ;;  %vm253_vm14 = vsmask.f32 4352  ;;  %vm256_vm15 = vcmask 1045509   ;;  %v22_v23 = vld [vmem:[#allocation2 + $0x8] sm:$0xff]  ;;  %v268_v60 = vld [vmem:[#allocation5] sm:$0xff] }
  0x11   :  { %v27_v7 = vsub.s32 0, %v26_v3  ;;  %v31_v8 = vsub.s32 1, %v26_v3  ;;  %v35_v9 = vsub.s32 2, %v26_v3  ;;  %v39_v10 = vsub.s32 3, %v26_v3  ;;  %vm243_vm11 = vmor %vm364_vm7, %vm360_vm4  ;;  %s346_s0 = smov [#allocation5]  }
  0x12   :  { %v43_v11 = vsub.s32 4, %v26_v3  ;;  %v47_v12 = vsub.s32 5, %v26_v3  ;;  %v51_v13 = vsub.s32 6, %v26_v3  ;;  %v55_v14 = vsub.s32 7, %v26_v3  ;;  %vm246_vm12 = vmand %vm244_vm5, %vm245_vm6  ;;  %s280_s11 = sshll.u32 %s346_s0, 4  ;;  %s281_s11 = int_to_ptr.vmem [resolvable:$true] %s280_s11 }
  0x13   :  { %vm374_vm13 = vmor %vm246_vm12, %vm243_vm11  ;;  %vm257_vm0 = vsmask.f32 5376  ;;  %vm260_vm1 = vcmask 1046534   ;;  %v146_v17 = vsub.s32 %v143_v5, %v26_v3  ;;  %vm261_vm3 = vsmask.f32 6400  ;;  %v271_v3 = vld [vmem:[#allocation5 + $0x8] sm:$0xff]  ;;  %p325_p6 = scmp.lt.s32.totalorder %s281_s11, %s281_s11 }
  0x14   :  { %vm380_vm2 = vmand %vm248_vm8, %vm249_vm9  ;;  %vm264_vm4 = vcmask 1047559   ;;  %vm265_vm7 = vsmask.f32 7424  ;;  %v28_v19 = vrot.slane %v21_v16, %v27_v7  ;;  %v32_v20 = vrot.slane %v21_v16, %v31_v8  ;;  %s320_s12 = scalar_lea.vmem %s281_s11, 256 }
  0x15   :  { %v36_v21 = vrot.slane %v21_v16, %v35_v9  ;;  %v40_v22 = vrot.slane %v21_v16, %v39_v10  ;;  %vm251_vm5 = vmor %vm380_vm2, %vm374_vm13  ;;  %v44_v24 = vrot.slane %v21_v16, %v43_v11  ;;  %v48_v25 = vrot.slane %v21_v16, %v47_v12  ;;  %p321_p5 = scmp.ne.s32.totalorder %s281_s11, %s320_s12  ;;  %p326_p7 = scmp.lt.s32.totalorder %s320_s12, %s320_s12 }
  0x16   :  { %v52_v26 = vrot.slane %v21_v16, %v51_v13  ;;  %v56_v27 = vrot.slane %v21_v16, %v55_v14  ;;  %vm254_vm6 = vmand %vm252_vm10, %vm253_vm14  ;;  %v289_v28 = vpack.c.bf16 %v32_v20, %v28_v19  ;;  %v60_v31 = vrot.slane %v22_v23, %v27_v7 }
  0x17   :  { %v290_v29 = vpack.c.bf16 %v40_v22, %v36_v21  ;;  %vm390_vm8 = vmor %vm254_vm6, %vm251_vm5  ;;  %v64_v32 = vrot.slane %v22_v23, %v31_v8  ;;  %v291_v33 = vpack.c.bf16 %v48_v25, %v44_v24  ;;  %v68_v36 = vrot.slane %v22_v23, %v35_v9  ;;  %p327_p8 = por %p326_p7, %p325_p6 }
  0x18   :  { %v292_v34 = vpack.c.bf16 %v56_v27, %v52_v26  ;;  %vm396_vm9 = vmand %vm256_vm15, %vm257_vm0  ;;  %v72_v37 = vrot.slane %v22_v23, %v39_v10  ;;  %v147_v38 = vrot.slane %v289_v28, %v146_v17  ;;  %v76_v40 = vrot.slane %v22_v23, %v43_v11 }
  0x19   :  { %v154_v39 = vrot.slane %v290_v29, %v146_v17  ;;  %vm259_vm10 = vmor %vm396_vm9, %vm390_vm8  ;;  %v80_v41 = vrot.slane %v22_v23, %v47_v12  ;;  %v161_v42 = vrot.slane %v291_v33, %v146_v17  ;;  %v84_v44 = vrot.slane %v22_v23, %v51_v13  ;;  %p328_p9 = pnand %p327_p8, %p321_p5 }
  0x1a   :  { %v168_v43 = vrot.slane %v292_v34, %v146_v17  ;;  %vm262_vm11 = vmand %vm260_vm1, %vm261_vm3  ;;  %v88_v45 = vrot.slane %v22_v23, %v55_v14  ;;  %v293_v48 = vpack.c.bf16 %v64_v32, %v60_v31  ;;  %v294_v49 = vpack.c.bf16 %v72_v37, %v68_v36 }
  0x1b   :  { %v169_v46 = vcombine.low %v147_v38, %v154_v39  ;;  %vm406_vm12 = vmor %vm262_vm11, %vm259_vm10  ;;  %v295_v50 = vpack.c.bf16 %v80_v41, %v76_v40 }
  0x1c   :  { %v170_v51 = vcombine.low %v161_v42, %v168_v43  ;;  %vm412_vm13 = vmand %vm264_vm4, %vm265_vm7  ;;  %v296_v53 = vpack.c.bf16 %v88_v45, %v84_v44  ;;  %v196_v55 = vrot.slane %v293_v48, %v146_v17  ;;  %v203_v56 = vrot.slane %v294_v49, %v146_v17 }
  0x1d   :  { %v177_v54 = vrot.slane %v169_v46, %v146_v17  ;;  %v210_v57 = vrot.slane %v295_v50, %v146_v17  ;;  %vm267_vm14 = vmor %vm412_vm13, %vm406_vm12 }
  0x1e   :  { %v184_v58 = vrot.slane %v170_v51, %v146_v17  ;;  %v217_v59 = vrot.slane %v296_v53, %v146_v17  ;;  %v218_v61 = vcombine.low %v196_v55, %v203_v56 }
  0x20   :  { %v185_v62 = vcombine.low %v177_v54, %v184_v58  ;;  %v219_v63 = vcombine.low %v210_v57, %v217_v59  ;;  %v226_v0 = vrot.slane %v218_v61, %v146_v17 }
  0x22   :  { %v269_v1 = vsel %vm267_vm14, %v185_v62, %v268_v60  ;;  %v233_v2 = vrot.slane %v219_v63, %v146_v17 }
  0x23   :  { %270 = vst [vmem:[#allocation5] sm:$0xff] %v269_v1 }
  0x24   :  { %v234_v4 = vcombine.low %v226_v0, %v233_v2 }
  0x26   :  { %v272_v5 = vsel %vm267_vm14, %v234_v4, %v271_v3 }
  0x27   :  { %273 = vst [vmem:[#allocation5 + $0x8] sm:$0xff] %v272_v5 }
  0x28   :  { %331 = shalt.err (!%p328_p9)
}
  0x29   :  { %283 = dma.vmem_to_hbm [thread:$0]  %s281_s11, 256, %s424_s1, [#allocation4]  }
  0x2a   :  { %342 = dma.done.wait [#allocation4], 256  }
  0x2b   :  { %343 = vsyncadd [#allocation4], 4294967040 }
  0x2c   :  { %287 = vsyncpa [#allocation3], 1 }
  0x2d   :  { %288 = vsyncpa [#allocation4], 1 }

</bundles_post_ra>
